<compile_context>
chip_gen: v7x
topology: tpu7x:2x2x1
jax: 0.10.0
libtpu: 0.0.40
codegen_flags: <defaults>
</compile_context>

<pallas_src>
import functools

import jax
import jax.numpy as jnp
from jax.experimental import pallas as pl
from jax.experimental.pallas import tpu as pltpu

_LANE = 128
_MAX_TILE_ROWS = 4096  # 4096 x 128 x 4B = 2 MiB per input tile per buffer
                       # (2 inputs x 2 buffers x 2 MiB = 8 MiB, fits v5e/v6e/v7x)


def _partial_sq_kernel(yhat_ref, y_ref, out_ref, *, rows_total, tile_rows, needs_mask):
    # yhat_ref / y_ref: (tile_rows, cols) views (batch & channel dims squeezed).
    pred = yhat_ref[...].astype(jnp.float32)
    tgt = y_ref[...].astype(jnp.float32)
    sq = (pred - tgt) ** 2
    if needs_mask:
        # Zero out rows past the true extent on the (partial) last row-tile.
        r = pl.program_id(1)
        row_ids = jax.lax.broadcasted_iota(jnp.int32, sq.shape, 0) + r * tile_rows
        sq = jnp.where(row_ids < rows_total, sq, 0.0)
    # Per-lane partial sums: mostly VPU adds across vregs plus one small sublane
    # reduce per tile. The cross-lane reduction happens once, outside the kernel.
    out_ref[...] = jnp.sum(sq, axis=0, keepdims=True)


def rmse_loss(yhat, y, *, max_tile_rows=_MAX_TILE_ROWS):
    """Pallas TPU implementation of sqrt(F.mse_loss(yhat[:, 0], y))."""
    B, C, H, W = yhat.shape
    assert y.shape == (B, H, W), f"y shape {y.shape} must equal {(B, H, W)}"
    S = H * W

    if S % _LANE == 0:
        # Lane-dense path: fold (H, W) into (rows, 128). Contiguous (free) reshape.
        rows, cols = S // _LANE, _LANE
        yhat_v = yhat.reshape(B, C, rows, cols)
        y_v = y.reshape(B, rows, cols)
    else:
        # Fallback: tile over H with the full W in the lane dim (still pipelined).
        rows, cols = H, W
        yhat_v = yhat
        y_v = y

    # Full extent if it fits; otherwise a multiple-of-8 row tile (legal block).
    tile_rows = rows if rows <= max_tile_rows else max_tile_rows
    num_tiles = (rows + tile_rows - 1) // tile_rows
    needs_mask = (rows % tile_rows) != 0

    kernel = functools.partial(
        _partial_sq_kernel,
        rows_total=rows,
        tile_rows=tile_rows,
        needs_mask=needs_mask,
    )

    partials = pl.pallas_call(
        kernel,
        out_shape=jax.ShapeDtypeStruct((B, num_tiles, 1, cols), jnp.float32),
        grid=(B, num_tiles),
        in_specs=[
            # yhat: select channel 0 via a squeezed size-1 channel block, so only
            # 1/C of yhat's bytes are DMA'd (contiguous chunk per (b, tile)).
            pl.BlockSpec(
                (pl.Squeezed(), pl.Squeezed(), tile_rows, cols),
                lambda b, r: (b, 0, r, 0),
            ),
            pl.BlockSpec(
                (pl.Squeezed(), tile_rows, cols),
                lambda b, r: (b, r, 0),
            ),
        ],
        out_specs=pl.BlockSpec(
            (pl.Squeezed(), pl.Squeezed(), 1, cols),
            lambda b, r: (b, r, 0, 0),
        ),
        compiler_params=pltpu.CompilerParams(
            dimension_semantics=("parallel", "parallel"),
        ),
    )(yhat_v, y_v)

    # Final cross-block / cross-lane reduce (O(B * num_tiles * 128) floats),
    # divide by the true element count exactly once, then sqrt.
    n_total = B * H * W
    return jnp.sqrt(jnp.sum(partials) / n_total)


if __name__ == "__main__":
    key = jax.random.PRNGKey(0)
    k1, k2 = jax.random.split(key)

    B, C, H, W = 2, 4, 16, 16
    yhat = jax.random.normal(k1, (B, C, H, W), dtype=jnp.float32)
    y = jax.random.normal(k2, (B, H, W), dtype=jnp.float32)

    result = rmse_loss(yhat, y)
    jax.block_until_ready(result)

    # Sanity check against plain-JAX reference.
    ref = jnp.sqrt(jnp.mean((yhat[:, 0] - y) ** 2))
    assert jnp.allclose(result, ref, rtol=1e-5, atol=1e-6), (result, ref)

    print("KERNEL_OK")
</pallas_src>

<mosaic_0001>
module attributes {stable_mosaic.version = 11 : i64} {
  func.func @_partial_sq_kernel(%arg0: i32, %arg1: i32, %arg2: memref<1x1x2x128xf32, #tpu.memory_space<vmem>>, %arg3: memref<1x2x128xf32, #tpu.memory_space<vmem>>, %arg4: memref<1x1x1x128xf32, #tpu.memory_space<vmem>>) attributes {dimension_semantics = [#tpu.dimension_semantics<parallel>, #tpu.dimension_semantics<parallel>], iteration_bounds = array<i64: 2, 1>, scalar_prefetch = 0 : i64, scratch_operands = 0 : i64, tpu.core_type = #tpu.core_type<tc>, window_params = [{transform_indices = @transform_0, window_bounds = array<i64: 1, 1, 2, 128>}, {transform_indices = @transform_1, window_bounds = array<i64: 1, 2, 128>}, {transform_indices = @transform_2, window_bounds = array<i64: 1, 1, 1, 128>}]} {
    %c0 = arith.constant 0 : index
    %c0_0 = arith.constant 0 : index
    %c0_1 = arith.constant 0 : index
    %c0_2 = arith.constant 0 : index
    %0 = vector.load %arg2[%c0, %c0_0, %c0_1, %c0_2] : memref<1x1x2x128xf32, #tpu.memory_space<vmem>>, vector<1x1x2x128xf32>
    %1 = vector.shape_cast %0 : vector<1x1x2x128xf32> to vector<2x128xf32>
    %c0_3 = arith.constant 0 : index
    %c0_4 = arith.constant 0 : index
    %c0_5 = arith.constant 0 : index
    %2 = vector.load %arg3[%c0_3, %c0_4, %c0_5] : memref<1x2x128xf32, #tpu.memory_space<vmem>>, vector<1x2x128xf32>
    %3 = vector.shape_cast %2 : vector<1x2x128xf32> to vector<2x128xf32>
    %4 = arith.subf %1, %3 : vector<2x128xf32>
    %5 = arith.mulf %4, %4 : vector<2x128xf32>
    %cst = arith.constant dense<0.000000e+00> : vector<128xf32>
    %6 = vector.multi_reduction <add>, %5, %cst [0] : vector<2x128xf32> to vector<128xf32>
    %7 = vector.shape_cast %6 : vector<128xf32> to vector<1x128xf32>
    %c0_6 = arith.constant 0 : index
    %c0_7 = arith.constant 0 : index
    %c0_8 = arith.constant 0 : index
    %c0_9 = arith.constant 0 : index
    %8 = vector.load %arg4[%c0_6, %c0_7, %c0_8, %c0_9] : memref<1x1x1x128xf32, #tpu.memory_space<vmem>>, vector<1x1x1x128xf32>
    %9 = vector.shape_cast %8 : vector<1x1x1x128xf32> to vector<1x128xf32>
    %10 = vector.shape_cast %7 : vector<1x128xf32> to vector<1x1x1x128xf32>
    tpu.vector_store %arg4[%c0_6, %c0_7, %c0_8, %c0_9], %10 {strides = array<i32>} : memref<1x1x1x128xf32, #tpu.memory_space<vmem>>, vector<1x1x1x128xf32>,
    return
  }
  func.func @transform_0(%arg0: i32, %arg1: i32) -> (i32, i32, i32, i32) {
    %c0_i32 = arith.constant 0 : i32
    %c0_i32_0 = arith.constant 0 : i32
    %c0_i32_1 = arith.constant 0 : i32
    return %arg0, %c0_i32, %arg1, %c0_i32_0 : i32, i32, i32, i32
  }
  func.func @transform_1(%arg0: i32, %arg1: i32) -> (i32, i32, i32) {
    %c0_i32 = arith.constant 0 : i32
    %c0_i32_0 = arith.constant 0 : i32
    return %arg0, %arg1, %c0_i32 : i32, i32, i32
  }
  func.func @transform_2(%arg0: i32, %arg1: i32) -> (i32, i32, i32, i32) {
    %c0_i32 = arith.constant 0 : i32
    %c0_i32_0 = arith.constant 0 : i32
    %c0_i32_1 = arith.constant 0 : i32
    return %arg0, %arg1, %c0_i32, %c0_i32_0 : i32, i32, i32, i32
  }
}

</mosaic_0001>

<bundles_post_ra>
// kernel: tpu_custom_call.1
= control target key start
LH: loop header
LB: loop body
LE: loop exit
PB: predicated region body
PF: predicated region fallthrough
CT: control target
= control target key end

     0   :  { %7 = vsyncpa [#allocation3], 0  ;;  %s811_s0 = inlined_call_operand.hbm [shape: f32[2,4,2,128], index: 0, kind: input, shape index: {}]   ;;  %s812_s1 = inlined_call_operand.hbm [shape: f32[2,2,128], index: 1, kind: input, shape index: {}]   ;;  %s813_s2 = inlined_call_operand.hbm [shape: f32[2,1,1,128], index: 2, kind: output, shape index: {}]  }
   0x1   :  { %9 = vsyncpa [#allocation3 + $0x1], 0 }
   0x2   :  { %10 = vsyncpa [#allocation6], 0 }
   0x3   :  { %12 = vsyncpa [#allocation6 + $0x1], 0 }
   0x4   :  { %13 = vsyncpa [#allocation4], 0 }
   0x5   :  { %15 = vsyncpa [#allocation4 + $0x1], 0  ;;  %s593_s9 = smov 0   ;;  %s595_s10 = smov 0  }
   0x6   :  { %s597_s11 = smov 0   ;;  %s599_s12 = smov 0  }
   0x7   :  { %s601_s13 = smov 0   ;;  %s603_s14 = smov 0  }
   0x8 LB: > { %s344_s15 = sadd.s32 4294967295, %s573_s14   ;;  %s345_s16 = sadd.s32 4294967294, %s573_s14   ;;  %s573_s14 = sphi %s603_s14, %s21_s14   ;;  %s569_s13 = sphi %s601_s13, %s833_s13   ;;  %s565_s12 = sphi %s599_s12, %s832_s12   ;;  %s561_s11 = sphi %s597_s11, %s831_s11   ;;  %s557_s10 = sphi %s595_s10, %s830_s10   ;;  %s553_s9 = sphi %s593_s9, %s829_s9  }
   0x9   : > { %s33_s17 = sadd.s32 1, %s569_s13  ;;  %s42_s18 = sadd.s32 1, %s561_s11 }
   0xa   : > { %p35_p0 = scmp.ge.s32.totalorder %s33_s17, 2  ;;  %p49_p1 = scmp.ne.s32.totalorder %s561_s11, %s557_s10 }
   0xb   : > { %p50_p2 = scmp.eq.s32.totalorder %s573_s14, 0  ;;  %p55_p3 = scmp.ne.s32.totalorder %s557_s10, %s553_s9 }
   0xc   : > { %s835_s17 = smov (%p35_p0, %s33_s17), 0  ;;  %p56_p5 = scmp.eq.s32.totalorder %s344_s15, 0 }
   0xd   : > { %p634_p4 = por %p50_p2, %p49_p1  ;;  %s37_s20 = ssub.s32 %s569_s13, %s835_s17 }
   0xe   : > { %p109_p6 = scmp.eq.s32.totalorder %s344_s15, 1  ;;  %p40_p7 = scmp.eq.s32.totalorder %s37_s20, 0 }
   0xf   : > { %p640_p8 = por %p56_p5, %p55_p3  ;;  %p115_p10 = scmp.eq.s32.totalorder %s345_s16, 1 }
  0x10   : > { %p644_p9 = por %p109_p6, %p49_p1  ;;  %p377_p13 = scmp.lt.s32.totalorder %s573_s14, 2 }
  0x11   : > { %s817_s21 = scalar_select %p640_p8, 1, 0 }
  0x12   : > { %s818_s22 = scalar_select %p644_p9, 1, 0 }
  0x13   : > { %s649_s23 = scalar_select %p40_p7, %s561_s11, %s42_s18  }
  0x14   : > { %p651_p11 = por %p115_p10, %p55_p3  ;;  %s658_s25 = sand.u32 1, %s561_s11  }
  0x15   : > { %s348_s26 = sshll.u32 %s658_s25, 1  ;;  %s359_s27 = sshll.u32 %s569_s13, 7 }
  0x16   : > { %s819_s24 = scalar_select %p651_p11, 1, 0 }
  0x17   : > { %s665_s30 = scalar_lea.hbm %s811_s0, %s359_s27  ;;  %s139_s3 = scalar_lea.vmem [#allocation2], %s348_s26 }
  0x18   : > { %s148_s4 = sshll.u32 %s139_s3, 4  ;;  %p673_p0 = pnand %p377_p13, %p634_p4  ;;  %s669_s4 = int_to_ptr.vmem [resolvable:$true] %s148_s4 }
  0x19   : > { %s136_s6 = scalar_lea.sflag [#allocation3], %s658_s25  ;;  %s427_s7 = scalar_lea.hbm %s665_s30, 32 }
  0x1a   : > { %p428_p3 = scmp.ne.s32.totalorder %s665_s30, %s427_s7  ;;  %p429_p5 = pneg %p673_p0 }
  0x1b   : > { %s432_s16 = scalar_lea.hbm %s811_s0, 256  ;;  %p433_p4 = scmp.lt.u32.totalorder %s665_s30, %s811_s0 }
  0x1c   : > { %p430_p6 = pnand %p429_p5, %p428_p3  ;;  %p434_p10 = scmp.lt.u32.totalorder %s432_s16, %s427_s7 }
  0x1d   : > { %p436_p12 = scmp.lt.u32.totalorder %s427_s7, %s665_s30 }
  0x1e   : > { %p431_p7 = pneg %p430_p6  ;;  %p435_p13 = por %p434_p10, %p433_p4 }
  0x20   : > { %p437_p1 = por %p436_p12, %p435_p13 }
  0x22   : > { %p438_p2 = pnand %p437_p1, %p431_p7 }
  0x24   : > { %441 = shalt.err (!%p438_p2)
}
  0x25   : > { %s442_s20 = scalar_lea.vmem %s669_s4, 32  ;;  %s575_s27 = smov [#allocation2]  }
  0x26   : > { %p443_p3 = scmp.ne.s32.totalorder %s669_s4, %s442_s20  ;;  %s447_s28 = sshll.u32 %s575_s27, 4  ;;  %s448_s28 = int_to_ptr.vmem [resolvable:$false] %s447_s28 }
  0x27   : > { %s449_s29 = scalar_lea.vmem %s448_s28, 64  ;;  %p450_p9 = scmp.lt.s32.totalorder %s669_s4, %s448_s28 }
  0x28   : > { %p445_p6 = pnand %p443_p3, %p429_p5  ;;  %p451_p4 = scmp.lt.s32.totalorder %s449_s29, %s442_s20 }
  0x2a   : > { %p446_p11 = pneg %p445_p6  ;;  %p452_p10 = por %p451_p4, %p450_p9 }
  0x2c   : > { %p453_p12 = pnand %p452_p10, %p446_p11 }
  0x2e   : > { %456 = shalt.err (!%p453_p12)
}
  0x2f   : > { %369 = dma.hbm_to_vmem [thread:$0]  (!%p673_p0), %s665_s30, 32, %s669_s4, %s136_s6  }
  0x30   : > { %p821_p1 = scmp.lt.s32.totalorder %s573_s14, 3  ;;  %p822_p2 = scmp.ge.s32.totalorder %s573_s14, 1 }
  0x31   : > { %s352_s7 = sshll.u32 %s569_s13, 5  ;;  %s159_s8 = scalar_lea.vmem [#allocation5], %s348_s26 }
  0x32   : > { %p709_p7 = pnand %p822_p2, %p821_p1  ;;  %s167_s15 = sshll.u32 %s159_s8, 4  ;;  %s168_s15 = int_to_ptr.vmem [resolvable:$true] %s167_s15 }
  0x33   : > { %s719_s19 = scalar_lea.hbm %s812_s1, %s352_s7  ;;  %s156_s30 = scalar_lea.sflag [#allocation6], %s658_s25 }
  0x34   : > { %s823_s3 = scalar_select %p709_p7, 1, 0 }
  0x35   : > { %s457_s4 = scalar_lea.hbm %s719_s19, 32  ;;  %s462_s20 = scalar_lea.hbm %s812_s1, 64 }
  0x36   : > { %p458_p9 = scmp.ne.s32.totalorder %s719_s19, %s457_s4  ;;  %p463_p3 = scmp.lt.u32.totalorder %s719_s19, %s812_s1 }
  0x37   : > { %p464_p6 = scmp.lt.u32.totalorder %s462_s20, %s457_s4  ;;  %p466_p10 = scmp.lt.u32.totalorder %s457_s4, %s719_s19 }
  0x38   : > { %p460_p11 = pnand %p458_p9, %p429_p5 }
  0x39   : > { %p465_p4 = por %p464_p6, %p463_p3 }
  0x3a   : > { %p461_p13 = pneg %p460_p11 }
  0x3b   : > { %p467_p12 = por %p466_p10, %p465_p4 }
  0x3d   : > { %p468_p1 = pnand %p467_p12, %p461_p13 }
  0x3f   : > { %471 = shalt.err (!%p468_p1)
}
  0x40   : > { %s472_s25 = scalar_lea.vmem %s168_s15, 32  ;;  %s576_s29 = smov [#allocation5]  }
  0x41   : > { %p473_p2 = scmp.ne.s32.totalorder %s168_s15, %s472_s25  ;;  %s477_s7 = sshll.u32 %s576_s29, 4  ;;  %s478_s7 = int_to_ptr.vmem [resolvable:$false] %s477_s7 }
  0x42   : > { %s479_s8 = scalar_lea.vmem %s478_s7, 64  ;;  %p480_p8 = scmp.lt.s32.totalorder %s168_s15, %s478_s7 }
  0x43   : > { %p475_p9 = pnand %p473_p2, %p429_p5  ;;  %p481_p7 = scmp.lt.s32.totalorder %s479_s8, %s472_s25 }
  0x45   : > { %p476_p11 = pneg %p475_p9  ;;  %p482_p3 = por %p481_p7, %p480_p8 }
  0x47   : > { %p483_p6 = pnand %p482_p3, %p476_p11 }
  0x49   : > { %486 = shalt.err (!%p483_p6)
}
  0x4a   : > { %372 = dma.hbm_to_vmem [thread:$0]  (!%p673_p0), %s719_s19, 32, %s168_s15, %s156_s30  }
  0x4b   : > { %p824_p13 = scmp.ne.s32.totalorder %s823_s3, 0 }
  0x4c   : > { %s744_s16 = sand.u32 (!%p824_p13), 1, %s557_s10   ;;  %p825_p5 = scmp.ne.s32.totalorder (!%p824_p13), %s817_s21, 0 }
  0x4d   : > { %176 = sbr.rel (%p824_p13) target bundleno = 119 (0x77), region = 28  ;;  %s354_s18 = sshll.u32 (!%p824_p13), %s744_s16, 1 }
  0x4e   : > { %s179_s4 = scalar_lea.sflag (!%p824_p13), [#allocation3], %s744_s16  ;;  %s182_s6 = scalar_lea.vmem (!%p824_p13), [#allocation2], %s354_s18 }
  0x54   : > { %540 = dma.done.wait (%p825_p5), %s179_s4, 32  }
  0x55   : > { %542 = vsyncadd (%p825_p5), %s179_s4, 4294967264  ;;  %s188_s5 = scalar_lea.sflag [#allocation6], %s744_s16  ;;  %s191_s15 = scalar_lea.vmem [#allocation5], %s354_s18 }
  0x56   : > { %544 = dma.done.wait (%p825_p5), %s188_s5, 32  }
  0x57   : > { %546 = vsyncadd (%p825_p5), %s188_s5, 4294967264  ;;  %v216_v0 = vld [vmem:[%s182_s6] sm:$0x3]  ;;  %v217_v1 = vld [vmem:[%s191_s15] sm:$0x3]  ;;  %vm220_vm0 = vcmask 1041408  }
  0x58   : > { %v218_v2 = vsub.f32 %v216_v0, %v217_v1  ;;  %s215_s3 = scalar_lea.vmem [#allocation7], %s744_s16  ;;  %s356_s30 = sshll.u32 %s565_s12, 4 }
  0x59   : > { %s243_s19 = sshll.u32 %s215_s3, 4  ;;  %s764_s20 = scalar_lea.hbm %s813_s2, %s356_s30  ;;  %s759_s19 = int_to_ptr.vmem [resolvable:$true] %s243_s19 }
  0x5a   : > { %v219_v3 = vmul.f32 %v218_v2, %v218_v2  ;;  %s230_s27 = scalar_lea.sflag [#allocation4], %s744_s16  ;;  %s487_s28 = scalar_lea.vmem %s759_s19, 16 }
  0x5b   : > { %p488_p8 = scmp.ne.s32.totalorder %s759_s19, %s487_s28  ;;  %p826_p0 = scmp.ne.s32.totalorder %s818_s22, 0 }
  0x5c   : > { %v221_v4 = vsel %vm220_vm0, %v219_v3, 0.0  ;;  %s577_s12 = smov [#allocation7]  }
  0x5d   : > { %v222_v5 = vrot.slane %v221_v4, 4  ;;  %p489_p7 = pnand %p488_p8, %p826_p0  ;;  %s491_s25 = sshll.u32 %s577_s12, 4  ;;  %s492_s25 = int_to_ptr.vmem [resolvable:$false] %s491_s25 }
  0x5e   : > { %s493_s29 = scalar_lea.vmem %s492_s25, 32  ;;  %p494_p10 = scmp.lt.s32.totalorder %s759_s19, %s492_s25 }
  0x5f   : > { %v223_v6 = vadd.f32 %v222_v5, %v221_v4  ;;  %p490_p4 = pneg %p489_p7  ;;  %p495_p12 = scmp.lt.s32.totalorder %s493_s29, %s487_s28 }
  0x61   : > { %v224_v7 = vrot.slane %v223_v6, 2  ;;  %p496_p1 = por %p495_p12, %p494_p10 }
  0x63   : > { %v225_v8 = vadd.f32 %v224_v7, %v223_v6  ;;  %p497_p2 = pnand %p496_p1, %p490_p4 }
  0x65   : > { %v226_v9 = vrot.slane %v225_v8, 1 }
  0x67   : > { %v227_v10 = vadd.f32 %v226_v9, %v225_v8 }
  0x69   : > { %228 = vst [vmem:[%s215_s3] sm:$0x1] %v227_v10 }
  0x6a   : > { %500 = shalt.err (!%p497_p2)
}
  0x6b   : > { %s501_s7 = scalar_lea.hbm %s764_s20, 16  ;;  %s505_s18 = scalar_lea.hbm %s813_s2, 32 }
  0x6c   : > { %p502_p9 = scmp.ne.s32.totalorder %s764_s20, %s501_s7  ;;  %p506_p6 = scmp.lt.u32.totalorder %s764_s20, %s813_s2 }
  0x6d   : > { %p507_p13 = scmp.lt.u32.totalorder %s505_s18, %s501_s7  ;;  %p509_p8 = scmp.lt.u32.totalorder %s501_s7, %s764_s20 }
  0x6e   : > { %p503_p11 = pnand %p502_p9, %p826_p0 }
  0x6f   : > { %p508_p5 = por %p507_p13, %p506_p6 }
  0x70   : > { %p504_p3 = pneg %p503_p11 }
  0x71   : > { %p510_p7 = por %p509_p8, %p508_p5 }
  0x73   : > { %p511_p4 = pnand %p510_p7, %p504_p3 }
  0x75   : > { %514 = shalt.err (!%p511_p4)
}
  0x76   : > { %364 = dma.vmem_to_hbm [thread:$0]  (%p826_p0), %s759_s19, 16, %s764_s20, %s230_s27  }
  0x77 PF: > { %s255_s5 = sand.u32 1, %s553_s9   ;;  %p827_p10 = scmp.ne.s32.totalorder %s819_s24, 0 }
  0x78   : > { %p828_p12 = scmp.ge.s32.totalorder %s573_s14, 2  ;;  %s256_s15 = scalar_lea.sflag [#allocation4], %s255_s5 }
  0x7a   : > { %p374_p1 = pnand %p828_p12, %p827_p10 }
  0x7c   : > { %548 = dma.done.wait (!%p374_p1), %s256_s15, 16  }
  0x7d   : > { %550 = vsyncadd (!%p374_p1), %s256_s15, 4294967280  ;;  %s21_s14 = sadd.s32 1, %s573_s14   ;;  %s829_s9 = smov %s557_s10 }
  0x7e   : > { %p18_p2 = scmp.ge.s32.totalorder %s21_s14, 4   ;;  %s830_s10 = smov %s561_s11 }
  0x7f   : > { %s831_s11 = smov %s649_s23  ;;  %s832_s12 = smov %s569_s13 }
  0x80   : > { %s833_s13 = smov %s835_s17  ;;  %20 = sbr.rel (!%p18_p2) target bundleno = 8 (0x8), region = 86 }
  0x87   :  { %260 = vsyncpa [#allocation3], 1 }
  0x88   :  { %262 = vsyncpa [#allocation3 + $0x1], 1 }
  0x89   :  { %263 = vsyncpa [#allocation6], 1 }
  0x8a   :  { %265 = vsyncpa [#allocation6 + $0x1], 1 }
  0x8b   :  { %266 = vsyncpa [#allocation4], 1 }
  0x8c   :  { %268 = vsyncpa [#allocation4 + $0x1], 1 }

</bundles_post_ra>
